<compile_context>
chip_gen: v7x
topology: tpu7x:2x2x1
jax: 0.10.0
libtpu: 0.0.40
codegen_flags: <defaults>
</compile_context>

<pallas_src>
import jax
import jax.numpy as jnp
from jax.experimental import pallas as pl
from jax.experimental.pallas import tpu as pltpu

Y_FDIM = 20   # input features
H1 = 15       # hidden
H2 = 10       # output


def _round_up(n, m):
    return (n + m - 1) // m * m


def net4_kernel(x_ref, w1_ref, b1_ref, w2_ref, b2_ref, o_ref):
    x = x_ref[...]            # (TB, 20) f32, streamed per batch tile
    w1 = w1_ref[...]          # (20, 15) f32, VMEM-resident
    b1 = b1_ref[...]          # (1, 15)  f32
    w2 = w2_ref[...]          # (15, 10) f32
    b2 = b2_ref[...]          # (1, 10)  f32

    # fc1 + LeakyReLU(0.2).  Since the slope (0.2) is positive,
    # leaky_relu(h) == max(h, 0.2*h): a single vmax on the VPU.
    h = jnp.dot(x, w1, preferred_element_type=jnp.float32) + b1
    h = jnp.maximum(h, 0.2 * h)

    # fc2 + sigmoid.  exp runs on the EUP; the approximate reciprocal also runs
    # on the EUP, avoiding a VALU Newton-iteration divide.
    z = jnp.dot(h, w2, preferred_element_type=jnp.float32) + b2
    o_ref[...] = pl.reciprocal(1.0 + jnp.exp(-z), approx=True).astype(o_ref.dtype)


def net4_forward(x, w1, b1, w2, b2, *, block_b=1024):
    """Fused Net4 forward.

    block_b: batch tile size (rows per grid step).  The per-tile VMEM footprint
    is tiny (~120 KiB f32 at block_b=1024, double-buffered), so this fits well
    within scoped-VMEM defaults on v5e/v6e/v7x while amortising per-step
    overhead and keeping DMA of tile i+1 overlapped with compute of tile i.
    """
    x = x.astype(jnp.float32)
    w1 = w1.astype(jnp.float32)
    b1 = b1.astype(jnp.float32).reshape(1, H1)
    w2 = w2.astype(jnp.float32)
    b2 = b2.astype(jnp.float32).reshape(1, H2)

    B = x.shape[0]
    # Batch tile: multiple of 8 sublanes; pad B up to a whole number of tiles.
    tb = block_b if B >= block_b else _round_up(B, 8)
    b_pad = _round_up(B, tb)
    if b_pad != B:
        x = jnp.pad(x, ((0, b_pad - B), (0, 0)))

    out = pl.pallas_call(
        net4_kernel,
        out_shape=jax.ShapeDtypeStruct((b_pad, H2), jnp.float32),
        grid=(b_pad // tb,),
        in_specs=[
            pl.BlockSpec((tb, Y_FDIM), lambda i: (i, 0)),   # x: streamed per tile
            pl.BlockSpec((Y_FDIM, H1), lambda i: (0, 0)),   # w1: resident
            pl.BlockSpec((1, H1), lambda i: (0, 0)),        # b1: resident
            pl.BlockSpec((H1, H2), lambda i: (0, 0)),       # w2: resident
            pl.BlockSpec((1, H2), lambda i: (0, 0)),        # b2: resident
        ],
        out_specs=pl.BlockSpec((tb, H2), lambda i: (i, 0)),
        compiler_params=pltpu.CompilerParams(
            # Batch tiles are independent -> shard across v7x's 2 TensorCores;
            # harmless on single-core v5e/v6e.
            dimension_semantics=("parallel",),
        ),
    )(x, w1, b1, w2, b2)

    return out[:B] if b_pad != B else out


def init_params(key):
    # Mirrors nn.Linear's U(-1/sqrt(fan_in), 1/sqrt(fan_in)); weights stored
    # as (in, out) so the kernel computes y = x @ W + b.
    k1, k2, k3, k4 = jax.random.split(key, 4)
    lim1 = 1.0 / jnp.sqrt(Y_FDIM)
    lim2 = 1.0 / jnp.sqrt(H1)
    w1 = jax.random.uniform(k1, (Y_FDIM, H1), jnp.float32, -lim1, lim1)
    b1 = jax.random.uniform(k2, (1, H1), jnp.float32, -lim1, lim1)
    w2 = jax.random.uniform(k3, (H1, H2), jnp.float32, -lim2, lim2)
    b2 = jax.random.uniform(k4, (1, H2), jnp.float32, -lim2, lim2)
    return w1, b1, w2, b2


if __name__ == "__main__":
    key = jax.random.PRNGKey(0)
    kx, kp = jax.random.split(key)

    # Small demo shapes; block_b=16 forces a 4-step grid to exercise the
    # batch-tiled pipeline (for a batch this small plain XLA would suffice —
    # the kernel pays off at large B).
    B = 64
    x = jax.random.normal(kx, (B, Y_FDIM), jnp.float32)
    w1, b1, w2, b2 = init_params(kp)

    out = net4_forward(x, w1, b1, w2, b2, block_b=16)
    out = jax.block_until_ready(out)

    # Pure-JAX f32 reference (matches the PyTorch module's forward).
    h_ref = jnp.dot(x, w1, preferred_element_type=jnp.float32) + b1
    h_ref = jnp.where(h_ref > 0, h_ref, 0.2 * h_ref)
    z_ref = jnp.dot(h_ref, w2, preferred_element_type=jnp.float32) + b2
    ref = jax.nn.sigmoid(z_ref)

    assert out.shape == (B, H2)
    # Tolerance covers the approx-reciprocal sigmoid (~2^-12 relative error).
    assert jnp.allclose(out, ref, atol=2e-3, rtol=2e-3), "mismatch vs reference"

    print("KERNEL_OK")
</pallas_src>

<mosaic_0001>
module attributes {stable_mosaic.version = 11 : i64} {
  func.func @net4_kernel(%arg0: i32, %arg1: memref<16x20xf32, #tpu.memory_space<vmem>>, %arg2: memref<20x15xf32, #tpu.memory_space<vmem>>, %arg3: memref<1x15xf32, #tpu.memory_space<vmem>>, %arg4: memref<15x10xf32, #tpu.memory_space<vmem>>, %arg5: memref<1x10xf32, #tpu.memory_space<vmem>>, %arg6: memref<16x10xf32, #tpu.memory_space<vmem>>) attributes {dimension_semantics = [#tpu.dimension_semantics<parallel>], iteration_bounds = array<i64: 4>, scalar_prefetch = 0 : i64, scratch_operands = 0 : i64, tpu.core_type = #tpu.core_type<tc>, window_params = [{transform_indices = @transform_0, window_bounds = array<i64: 16, 20>}, {pipeline_mode = #tpu.pipeline_mode<synchronous>, transform_indices = @transform_1, window_bounds = array<i64: 20, 15>}, {pipeline_mode = #tpu.pipeline_mode<synchronous>, transform_indices = @transform_2, window_bounds = array<i64: 1, 15>}, {pipeline_mode = #tpu.pipeline_mode<synchronous>, transform_indices = @transform_3, window_bounds = array<i64: 15, 10>}, {pipeline_mode = #tpu.pipeline_mode<synchronous>, transform_indices = @transform_4, window_bounds = array<i64: 1, 10>}, {transform_indices = @transform_5, window_bounds = array<i64: 16, 10>}]} {
    %c0 = arith.constant 0 : index
    %c0_0 = arith.constant 0 : index
    %0 = vector.load %arg1[%c0, %c0_0] : memref<16x20xf32, #tpu.memory_space<vmem>>, vector<16x20xf32>
    %c0_1 = arith.constant 0 : index
    %c0_2 = arith.constant 0 : index
    %1 = vector.load %arg2[%c0_1, %c0_2] : memref<20x15xf32, #tpu.memory_space<vmem>>, vector<20x15xf32>
    %c0_3 = arith.constant 0 : index
    %c0_4 = arith.constant 0 : index
    %2 = vector.load %arg3[%c0_3, %c0_4] : memref<1x15xf32, #tpu.memory_space<vmem>>, vector<1x15xf32>
    %c0_5 = arith.constant 0 : index
    %c0_6 = arith.constant 0 : index
    %3 = vector.load %arg4[%c0_5, %c0_6] : memref<15x10xf32, #tpu.memory_space<vmem>>, vector<15x10xf32>
    %c0_7 = arith.constant 0 : index
    %c0_8 = arith.constant 0 : index
    %4 = vector.load %arg5[%c0_7, %c0_8] : memref<1x10xf32, #tpu.memory_space<vmem>>, vector<1x10xf32>
    %cst = arith.constant dense<0.000000e+00> : vector<16x15xf32>
    %5 = tpu.matmul %0, %1, %cst {dimension_numbers = #tpu.dot_dimension_numbers<[1], [0], [0], [1], [0, 0, 1, 1], [], []>} : vector<16x20xf32>, vector<20x15xf32>, vector<16x15xf32> -> vector<16x15xf32>
    %6 = vector.broadcast %2 : vector<1x15xf32> to vector<16x15xf32>
    %7 = arith.addf %5, %6 : vector<16x15xf32>
    %cst_9 = arith.constant 2.000000e-01 : f32
    %8 = vector.broadcast %cst_9 : f32 to vector<16x15xf32>
    %9 = arith.mulf %8, %7 : vector<16x15xf32>
    %10 = arith.maximumf %7, %9 : vector<16x15xf32>
    %cst_10 = arith.constant dense<0.000000e+00> : vector<16x10xf32>
    %11 = tpu.matmul %10, %3, %cst_10 {dimension_numbers = #tpu.dot_dimension_numbers<[1], [0], [0], [1], [0, 0, 1, 1], [], []>} : vector<16x15xf32>, vector<15x10xf32>, vector<16x10xf32> -> vector<16x10xf32>
    %12 = vector.broadcast %4 : vector<1x10xf32> to vector<16x10xf32>
    %13 = arith.addf %11, %12 : vector<16x10xf32>
    %cst_11 = arith.constant 0.000000e+00 : f32
    %14 = vector.broadcast %cst_11 : f32 to vector<16x10xf32>
    %15 = arith.subf %14, %13 : vector<16x10xf32>
    %16 = math.exp %15 : vector<16x10xf32>
    %cst_12 = arith.constant 1.000000e+00 : f32
    %17 = vector.broadcast %cst_12 : f32 to vector<16x10xf32>
    %18 = arith.addf %17, %16 : vector<16x10xf32>
    %19 = tpu.reciprocal %18 {approx = true} : vector<16x10xf32> -> vector<16x10xf32>
    %c0_13 = arith.constant 0 : index
    %c0_14 = arith.constant 0 : index
    %20 = vector.load %arg6[%c0_13, %c0_14] : memref<16x10xf32, #tpu.memory_space<vmem>>, vector<16x10xf32>
    tpu.vector_store %arg6[%c0_13, %c0_14], %19 {strides = array<i32>} : memref<16x10xf32, #tpu.memory_space<vmem>>, vector<16x10xf32>,
    return
  }
  func.func @transform_0(%arg0: i32) -> (i32, i32) {
    %c0_i32 = arith.constant 0 : i32
    %c0_i32_0 = arith.constant 0 : i32
    return %arg0, %c0_i32 : i32, i32
  }
  func.func @transform_1(%arg0: i32) -> (i32, i32) {
    %c0_i32 = arith.constant 0 : i32
    %c0_i32_0 = arith.constant 0 : i32
    %c0_i32_1 = arith.constant 0 : i32
    return %c0_i32, %c0_i32_0 : i32, i32
  }
  func.func @transform_2(%arg0: i32) -> (i32, i32) {
    %c0_i32 = arith.constant 0 : i32
    %c0_i32_0 = arith.constant 0 : i32
    %c0_i32_1 = arith.constant 0 : i32
    return %c0_i32, %c0_i32_0 : i32, i32
  }
  func.func @transform_3(%arg0: i32) -> (i32, i32) {
    %c0_i32 = arith.constant 0 : i32
    %c0_i32_0 = arith.constant 0 : i32
    %c0_i32_1 = arith.constant 0 : i32
    return %c0_i32, %c0_i32_0 : i32, i32
  }
  func.func @transform_4(%arg0: i32) -> (i32, i32) {
    %c0_i32 = arith.constant 0 : i32
    %c0_i32_0 = arith.constant 0 : i32
    %c0_i32_1 = arith.constant 0 : i32
    return %c0_i32, %c0_i32_0 : i32, i32
  }
  func.func @transform_5(%arg0: i32) -> (i32, i32) {
    %c0_i32 = arith.constant 0 : i32
    %c0_i32_0 = arith.constant 0 : i32
    return %arg0, %c0_i32 : i32, i32
  }
}

</mosaic_0001>

<bundles_post_ra>
// kernel: tpu_custom_call.1
= control target key start
LH: loop header
LB: loop body
LE: loop exit
PB: predicated region body
PF: predicated region fallthrough
CT: control target
= control target key end

     0   :  { %s604_s18 = smov 0   ;;  %s649_s0 = inlined_call_operand.vmem [shape: f32[64,20], index: 0, kind: input, shape index: {}]   ;;  %s650_s1 = inlined_call_operand.vmem [shape: f32[20,15], index: 1, kind: input, shape index: {}]   ;;  %s651_s2 = inlined_call_operand.vmem [shape: f32[1,15], index: 2, kind: input, shape index: {}]   ;;  %s652_s3 = inlined_call_operand.vmem [shape: f32[15,10], index: 3, kind: input, shape index: {}]   ;;  %s653_s4 = inlined_call_operand.vmem [shape: f32[1,10], index: 4, kind: input, shape index: {}]   ;;  %s654_s5 = inlined_call_operand.vmem [shape: f32[64,10], index: 5, kind: output, shape index: {}]  }
   0x1 LB: > { %s494_s19 = sadd.s32 4294967295, %s571_s18   ;;  %p498_p0 = scmp.ge.s32.totalorder %s571_s18, 1  ;;  %s571_s18 = sphi %s604_s18, %s15_s18  }
   0x2   : > { %p188_p1 = scmp.lt.s32.totalorder %s571_s18, 5 }
   0x4   : > { %p189_p2 = pnand %p498_p0, %p188_p1 }
   0x5   : > { %v230_v0 = vld [vmem:[%s650_s1] sm:$0xff] (!%p189_p2)  ;;  %v231_v1 = vld [vmem:[%s650_s1 + $0x8] sm:$0xff] (!%p189_p2)  ;;  %s499_s24 = sshll.u32 (!%p189_p2), %s494_s19, 1  ;;  %v232_v3 = vld [vmem:[%s650_s1 + $0x10] sm:$0xf] (!%p189_p2)  ;;  %vm250_vm0 = vcmask (!%p189_p2), 1043456  }
   0x6   : > { %192 = sbr.rel (%p189_p2) target bundleno = 483 (0x1e3), region = 40  ;;  %v538_v2 = vpack.c.bf16 (!%p189_p2), %v231_v1, %v230_v0  ;;  %p217_p3 = scmp.lt.s32.totalorder (!%p189_p2), %s499_s24, 7  ;;  %vm243_vm1 = vcmask (!%p189_p2), 162816   ;;  %v234_v6 = vld [vmem:[%s652_s3] sm:$0xff] (!%p189_p2)  ;;  %v235_v7 = vld [vmem:[%s652_s3 + $0x8] sm:$0x7f] (!%p189_p2) }
   0x7   : > { %vm346_vm2 = vcmask (!%p189_p2), 1046528   ;;  %v542_v8 = vpack.c.bf16 (!%p189_p2), %v235_v7, %v234_v6  ;;  %vm573_vm3 = vmmov (!%p189_p2), 1   ;;  %v503_v9 = vld [vmem:[%s651_s2] ss:$0 sm:$0xff] (!%p189_p2)  ;;  %vm339_vm5 = vcmask (!%p189_p2), 121856  }
   0x8   : > { %539 = vmatprep.subr.bf16.mxu0 (!%p189_p2), %v538_v2  ;;  %vm543_vm4 = vmpackc.low (!%p189_p2), %vm346_vm2, %vm573_vm3  ;;  %v507_v18 = vld [vmem:[%s653_s4] ss:$0 sm:$0xff] (!%p189_p2)  ;;  %vm435_vm6 = vcmask (!%p189_p2), 80896  }
   0x9   : > { %541 = vmatpush3.bf16.msra.mxu0 (!%p189_p2), %v538_v2  ;;  %544 = vmatprep.subr.msk.bf16.mxu1 (!%p189_p2), %vm543_vm4, %v542_v8 }
   0xa   : > { %526 = vmatprep.subr.msk.mxu0 (!%p189_p2), %vm250_vm0, %v232_v3  ;;  %547 = vmatpush3.bf16.msk.msra.mxu1 (!%p189_p2), %vm543_vm4, %v542_v8 }
   0xd   : > { %s656_s24 = smov (!%p217_p3, %s499_s24), 7  ;;  %527 = vmatpush3.msk.msra.mxu0 %vm250_vm0, %v232_v3 }
   0xe   : > { %s500_s27 = sshll.u32 %s656_s24, 3 }
   0xf   : > { %s220_s30 = scalar_lea.vmem %s649_s0, %s500_s27  ;;  %s226_s16 = scalar_lea.vmem %s654_s5, %s500_s27 }
  0x10   : > { %v228_v4 = vld [vmem:[%s220_s30] sm:$0xff]  ;;  %v229_v5 = vld [vmem:[%s220_s30 + $0x8] sm:$0xff] }
  0x11   : > { %528 = vmatprep.mubr.msk.f32.mxu0 %vm243_vm1, %v228_v4 }
  0x12   : > { %529 = vmatmul.mubr.msk.f32.vlgmr.msra.gmra.mrb[0].mxu0 %vm243_vm1, %v229_v5 }
  0xe5   : > { %v530_v10 = vpop.f32.mrb[0].mxu0 }
  0xe6   : > { %v326_v11 = vadd.f32 %v530_v10, %v503_v9  ;;  %v320_v12 = vpop.f32.mrb[1].mxu0 }
  0xe7   : > { %v321_v13 = vadd.f32 %v503_v9, %v320_v12 }
  0xe8   : > { %v330_v14 = vmul.f32 0.2, %v326_v11 }
  0xe9   : > { %v329_v15 = vmul.f32 0.2, %v321_v13 }
  0xea   : > { %v332_v17 = vmax.f32 %v326_v11, %v330_v14 }
  0xeb   : > { %v331_v16 = vmax.f32 %v321_v13, %v329_v15 }
  0xed   : > { %535 = vmatprep.mubr.msk.f32.mxu1 %vm339_vm5, %v331_v16 }
  0xee   : > { %536 = vmatmul.mubr.msk.f32.vlgmr.msra.gmra.mrb[0].mxu1 %vm339_vm5, %v332_v17 }
 0x1c1   : > { %v537_v19 = vpop.f32.mrb[0].mxu1 }
 0x1c2   : > { %v422_v20 = vadd.f32 %v537_v19, %v507_v18  ;;  %v416_v21 = vpop.f32.mrb[1].mxu1 }
 0x1c3   : > { %v417_v22 = vadd.f32 %v507_v18, %v416_v21 }
 0x1c4   : > { %v426_v23 = vsub.f32 0.0, %v422_v20 }
 0x1c5   : > { %v425_v24 = vsub.f32 0.0, %v417_v22 }
 0x1c6   : > { %v429_v25 = vmul.f32 1.442695, %v426_v23 }
 0x1c7   : > { %v427_v26 = vmul.f32 1.442695, %v425_v24 }
 0x1c8   : > { %557 = vpow2.f32 %v429_v25 }
 0x1c9   : > { %559 = vpow2.f32 %v427_v26 }
 0x1d2   : > { %v558_v27 = vpop.eup %557 }
 0x1d3   : > { %v560_v28 = vpop.eup %559  ;;  %v432_v29 = vadd.f32 1.0, %v558_v27 }
 0x1d4   : > { %v431_v30 = vadd.f32 1.0, %v560_v28 }
 0x1d6   : > { %561 = vrcp.f32 %v431_v30 }
 0x1d7   : > { %563 = vrcp.f32 %v432_v29 }
 0x1e0   : > { %v562_v31 = vpop.eup %561 }
 0x1e1   : > { %v564_v32 = vpop.eup %563  ;;  %436 = vst.msk [vmem:[%s226_s16] sm:$0xff] %vm435_vm6, %v562_v31 }
 0x1e2   : > { %437 = vst.msk [vmem:[%s226_s16 + $0x8] sm:$0xff] %vm435_vm6, %v564_v32 }
 0x1e3 PF: > { %s15_s18 = sadd.s32 1, %s571_s18  }
 0x1e4   : > { %p12_p4 = scmp.ge.s32.totalorder %s15_s18, 6  }
 0x1e6   :  { %14 = sbr.rel (!%p12_p4) target bundleno = 1 (0x1), region = 70 }

</bundles_post_ra>
